<compile_context>
chip_gen: v6e
topology: v6e:2x2x1
jax: 0.10.0
libtpu: 0.0.40
codegen_flags: <defaults>
</compile_context>

<pallas_src>
import functools

import jax
import jax.numpy as jnp
from jax.experimental import pallas as pl
from jax.experimental.pallas import tpu as pltpu


def _tem_partial_kernel(pred_ref, gt_ref, out_ref, *, tn, n_rows, nb, mask_rows):
    """Accumulate per-lane partial sums for one (tn, 3*L) row block.

    out_ref: (3, 3*L) f32, resident across the inner (arbitrary) grid axis:
      out_ref[0, :] = sum over rows of pmask
      out_ref[1, :] = sum over rows of pmask * log(pred)
      out_ref[2, :] = sum over rows of log(where(pmask, pred, 1 - pred))
    """
    i = pl.program_id(1)

    @pl.when(i == 0)
    def _init():
        out_ref[...] = jnp.zeros_like(out_ref)

    pred = pred_ref[...].astype(jnp.float32)
    gt = gt_ref[...].astype(jnp.float32)

    mask = gt >= 0.5
    sel = jnp.where(mask, pred, 1.0 - pred)

    if mask_rows:
        # Rows past N (partial edge block or clamped duplicate block) must
        # contribute exactly zero: force log(1) = 0 and pmask = 0 there.
        p = pl.program_id(0)
        row0 = (p * nb + i) * tn
        rows = row0 + jax.lax.broadcasted_iota(jnp.int32, (tn, 1), 0)
        valid = rows < n_rows
        mask = jnp.logical_and(mask, valid)
        sel = jnp.where(valid, sel, 1.0)

    log_sel = jnp.log(sel)                        # one EUP log per element
    pmask = mask.astype(jnp.float32)
    pos = jnp.where(mask, log_sel, 0.0)           # == pmask * log(pred)

    out_ref[0:1, :] += jnp.sum(pmask, axis=0, keepdims=True)
    out_ref[1:2, :] += jnp.sum(pos, axis=0, keepdims=True)
    out_ref[2:3, :] += jnp.sum(log_sel, axis=0, keepdims=True)


def tem_loss(pred_anchors, gt_scores, *, block_bytes=4 << 20, num_parallel=2,
             vmem_limit_bytes=48 << 20):
    """pred_anchors, gt_scores: (N, 3, L). Returns (loss_start, loss_action, loss_end)."""
    N, C, L = pred_anchors.shape
    assert C == 3 and gt_scores.shape == (N, C, L)
    lanes = C * L

    # Zero-cost view of the contiguous (N, 3, L) arrays: contiguous DMAs, full
    # vreg density, no sublane padding of the size-3 channel dim.
    pred2d = pred_anchors.reshape(N, lanes)
    gt2d = gt_scores.reshape(N, lanes)

    itemsize = jnp.dtype(pred_anchors.dtype).itemsize
    rows_per_block = max(8, (block_bytes // (lanes * itemsize)) // 8 * 8)
    tn = N if rows_per_block >= N else int(rows_per_block)

    total_blocks = pl.cdiv(N, tn)
    n_par = max(1, min(num_parallel, total_blocks))   # 2-way split for v7x megacore
    nb = pl.cdiv(total_blocks, n_par)
    mask_rows = (n_par * nb * tn != N)

    # Clamp so duplicate trailing blocks (when n_par*nb > total_blocks) re-read a
    # valid block; their rows are masked to zero contribution in-kernel.
    def in_idx(p, i):
        return (jnp.minimum(p * nb + i, total_blocks - 1), 0)

    kernel = functools.partial(_tem_partial_kernel, tn=tn, n_rows=N, nb=nb,
                               mask_rows=mask_rows)

    partials = pl.pallas_call(
        kernel,
        out_shape=jax.ShapeDtypeStruct((n_par, 3, lanes), jnp.float32),
        grid_spec=pltpu.PrefetchScalarGridSpec(
            num_scalar_prefetch=0,
            grid=(n_par, nb),
            in_specs=[
                pl.BlockSpec((tn, lanes), in_idx),
                pl.BlockSpec((tn, lanes), in_idx),
            ],
            out_specs=pl.BlockSpec((None, 3, lanes), lambda p, i: (p, 0, 0)),
        ),
        compiler_params=pltpu.CompilerParams(
            dimension_semantics=("parallel", "arbitrary"),
            vmem_limit_bytes=vmem_limit_bytes,
        ),
    )(pred2d, gt2d)

    # Tiny finalize in plain JAX: (n_par, 3, 3*L) -> per-channel scalars.
    sums = partials.reshape(n_par, 3, C, L).sum(axis=(0, 3))   # (quantity, channel)
    num_pos, pos_sum, logsel_sum = sums[0], sums[1], sums[2]
    neg_sum = logsel_sum - pos_sum              # sum((1-pmask) * log(1-pred))
    ne = jnp.float32(N * L)
    # NOTE: degenerate masks (0 or all positives) left unguarded, same as reference.
    ratio = ne / num_pos
    coef_0 = 0.5 * ratio / (ratio - 1.0)
    coef_1 = coef_0 * (ratio - 1.0)
    losses = -(coef_1 * pos_sum + coef_0 * neg_sum) / ne
    return losses[0], losses[1], losses[2]


def _reference_tem_loss(pred_anchors, gt_scores):
    def one(gt_c, pred_c):
        pmask = (gt_c >= 0.5).astype(jnp.float32)
        num_positive = pmask.sum()
        num_entries = pmask.shape[0] * pmask.shape[1]
        ratio = num_entries / num_positive
        coef_0 = 0.5 * ratio / (ratio - 1.0)
        coef_1 = coef_0 * (ratio - 1.0)
        loss = (coef_1 * pmask * jnp.log(pred_c)
                + coef_0 * (1.0 - pmask) * jnp.log(1.0 - pred_c))
        return -jnp.mean(loss)
    return tuple(one(gt_scores[:, c, :], pred_anchors[:, c, :]) for c in range(3))


if __name__ == "__main__":
    key = jax.random.PRNGKey(0)

    def make_inputs(k, N, L):
        k_pred, k_gt = jax.random.split(k)
        # pred_anchors are probabilities in (0, 1) (sigmoid head in TEM).
        pred = jax.nn.sigmoid(jax.random.normal(k_pred, (N, 3, L), jnp.float32))
        pred = jnp.clip(pred, 1e-4, 1.0 - 1e-4)
        gt = jax.random.uniform(k_gt, (N, 3, L), jnp.float32)
        # ensure at least one positive and one negative per channel (finite ratio)
        gt = gt.at[:, :, 0].set(0.9).at[:, :, 1].set(0.1)
        return pred, gt

    k1, k2 = jax.random.split(key)

    # (a) L multiple of 128, whole batch in one block (grid (1, 1)).
    pred_a, gt_a = make_inputs(k1, 20, 128)
    ref_a = _reference_tem_loss(pred_a, gt_a)
    got_a1 = jax.block_until_ready(tem_loss(pred_a, gt_a))
    # (b) tiny block budget -> tn=8, 3 row blocks split over 2 parallel slices:
    #     exercises multi-step accumulation, row masking and duplicate-block clamp.
    got_a2 = jax.block_until_ready(tem_loss(pred_a, gt_a, block_bytes=1))

    # (c) BSN-style L=100 (3*L=300 lanes, not a multiple of 128).
    pred_c, gt_c = make_inputs(k2, 5, 100)
    ref_c = _reference_tem_loss(pred_c, gt_c)
    got_c = jax.block_until_ready(tem_loss(pred_c, gt_c))

    for got, ref in ((got_a1, ref_a), (got_a2, ref_a), (got_c, ref_c)):
        for g, r in zip(got, ref):
            assert jnp.allclose(g, r, rtol=1e-5, atol=1e-5), (g, r)

    print("KERNEL_OK")
</pallas_src>

<mosaic_0001>
module attributes {stable_mosaic.version = 11 : i64} {
  func.func @_tem_partial_kernel(%arg0: i32, %arg1: i32, %arg2: memref<20x384xf32, #tpu.memory_space<vmem>>, %arg3: memref<20x384xf32, #tpu.memory_space<vmem>>, %arg4: memref<1x3x384xf32, #tpu.memory_space<vmem>>) attributes {dimension_semantics = [#tpu.dimension_semantics<parallel>, #tpu.dimension_semantics<arbitrary>], iteration_bounds = array<i64: 1, 1>, scalar_prefetch = 0 : i64, scratch_operands = 0 : i64, tpu.core_type = #tpu.core_type<tc>, window_params = [{transform_indices = @transform_0, window_bounds = array<i64: 20, 384>}, {transform_indices = @transform_1, window_bounds = array<i64: 20, 384>}, {transform_indices = @transform_2, window_bounds = array<i64: 1, 3, 384>}]} {
    %c0_i32 = arith.constant 0 : i32
    %0 = arith.cmpi eq, %arg1, %c0_i32 : i32
    %1 = arith.extui %0 : i1 to i32
    %c0_i32_0 = arith.constant 0 : i32
    %2 = arith.cmpi ne, %1, %c0_i32_0 : i32
    scf.if %2 {
      %cst_25 = arith.constant 0.000000e+00 : f32
      %39 = vector.broadcast %cst_25 : f32 to vector<3x384xf32>
      %c0_26 = arith.constant 0 : index
      %c0_27 = arith.constant 0 : index
      %c0_28 = arith.constant 0 : index
      %40 = vector.load %arg4[%c0_26, %c0_27, %c0_28] : memref<1x3x384xf32, #tpu.memory_space<vmem>>, vector<1x3x384xf32>
      %41 = vector.shape_cast %40 : vector<1x3x384xf32> to vector<3x384xf32>
      %42 = vector.shape_cast %39 : vector<3x384xf32> to vector<1x3x384xf32>
      tpu.vector_store %arg4[%c0_26, %c0_27, %c0_28], %42 {strides = array<i32>} : memref<1x3x384xf32, #tpu.memory_space<vmem>>, vector<1x3x384xf32>,
    } else {
    }
    %c0 = arith.constant 0 : index
    %c0_1 = arith.constant 0 : index
    %3 = vector.load %arg2[%c0, %c0_1] : memref<20x384xf32, #tpu.memory_space<vmem>>, vector<20x384xf32>
    %c0_2 = arith.constant 0 : index
    %c0_3 = arith.constant 0 : index
    %4 = vector.load %arg3[%c0_2, %c0_3] : memref<20x384xf32, #tpu.memory_space<vmem>>, vector<20x384xf32>
    %cst = arith.constant 5.000000e-01 : f32
    %5 = vector.broadcast %cst : f32 to vector<20x384xf32>
    %6 = arith.cmpf oge, %4, %5 : vector<20x384xf32>
    %cst_4 = arith.constant 1.000000e+00 : f32
    %7 = vector.broadcast %cst_4 : f32 to vector<20x384xf32>
    %8 = arith.subf %7, %3 : vector<20x384xf32>
    %9 = arith.select %6, %3, %8 : vector<20x384xi1>, vector<20x384xf32>
    %10 = math.log %9 : vector<20x384xf32>
    %11 = arith.extui %6 : vector<20x384xi1> to vector<20x384xi32>
    %12 = arith.sitofp %11 : vector<20x384xi32> to vector<20x384xf32>
    %cst_5 = arith.constant 0.000000e+00 : f32
    %13 = vector.broadcast %cst_5 : f32 to vector<20x384xf32>
    %14 = arith.select %6, %10, %13 : vector<20x384xi1>, vector<20x384xf32>
    %c0_6 = arith.constant 0 : index
    %c0_7 = arith.constant 0 : index
    %c0_8 = arith.constant 0 : index
    %15 = vector.load %arg4[%c0_6, %c0_7, %c0_8] : memref<1x3x384xf32, #tpu.memory_space<vmem>>, vector<1x1x384xf32>
    %16 = vector.shape_cast %15 : vector<1x1x384xf32> to vector<1x384xf32>
    %cst_9 = arith.constant dense<0.000000e+00> : vector<384xf32>
    %17 = vector.multi_reduction <add>, %12, %cst_9 [0] : vector<20x384xf32> to vector<384xf32>
    %18 = vector.shape_cast %17 : vector<384xf32> to vector<1x384xf32>
    %19 = arith.addf %16, %18 : vector<1x384xf32>
    %c0_10 = arith.constant 0 : index
    %c0_11 = arith.constant 0 : index
    %c0_12 = arith.constant 0 : index
    %20 = vector.load %arg4[%c0_10, %c0_11, %c0_12] : memref<1x3x384xf32, #tpu.memory_space<vmem>>, vector<1x1x384xf32>
    %21 = vector.shape_cast %20 : vector<1x1x384xf32> to vector<1x384xf32>
    %22 = vector.shape_cast %19 : vector<1x384xf32> to vector<1x1x384xf32>
    tpu.vector_store %arg4[%c0_10, %c0_11, %c0_12], %22 {strides = array<i32>} : memref<1x3x384xf32, #tpu.memory_space<vmem>>, vector<1x1x384xf32>,
    %c0_13 = arith.constant 0 : index
    %c1 = arith.constant 1 : index
    %c0_14 = arith.constant 0 : index
    %23 = vector.load %arg4[%c0_13, %c1, %c0_14] : memref<1x3x384xf32, #tpu.memory_space<vmem>>, vector<1x1x384xf32>
    %24 = vector.shape_cast %23 : vector<1x1x384xf32> to vector<1x384xf32>
    %cst_15 = arith.constant dense<0.000000e+00> : vector<384xf32>
    %25 = vector.multi_reduction <add>, %14, %cst_15 [0] : vector<20x384xf32> to vector<384xf32>
    %26 = vector.shape_cast %25 : vector<384xf32> to vector<1x384xf32>
    %27 = arith.addf %24, %26 : vector<1x384xf32>
    %c0_16 = arith.constant 0 : index
    %c1_17 = arith.constant 1 : index
    %c0_18 = arith.constant 0 : index
    %28 = vector.load %arg4[%c0_16, %c1_17, %c0_18] : memref<1x3x384xf32, #tpu.memory_space<vmem>>, vector<1x1x384xf32>
    %29 = vector.shape_cast %28 : vector<1x1x384xf32> to vector<1x384xf32>
    %30 = vector.shape_cast %27 : vector<1x384xf32> to vector<1x1x384xf32>
    tpu.vector_store %arg4[%c0_16, %c1_17, %c0_18], %30 {strides = array<i32>} : memref<1x3x384xf32, #tpu.memory_space<vmem>>, vector<1x1x384xf32>,
    %c0_19 = arith.constant 0 : index
    %c2 = arith.constant 2 : index
    %c0_20 = arith.constant 0 : index
    %31 = vector.load %arg4[%c0_19, %c2, %c0_20] : memref<1x3x384xf32, #tpu.memory_space<vmem>>, vector<1x1x384xf32>
    %32 = vector.shape_cast %31 : vector<1x1x384xf32> to vector<1x384xf32>
    %cst_21 = arith.constant dense<0.000000e+00> : vector<384xf32>
    %33 = vector.multi_reduction <add>, %10, %cst_21 [0] : vector<20x384xf32> to vector<384xf32>
    %34 = vector.shape_cast %33 : vector<384xf32> to vector<1x384xf32>
    %35 = arith.addf %32, %34 : vector<1x384xf32>
    %c0_22 = arith.constant 0 : index
    %c2_23 = arith.constant 2 : index
    %c0_24 = arith.constant 0 : index
    %36 = vector.load %arg4[%c0_22, %c2_23, %c0_24] : memref<1x3x384xf32, #tpu.memory_space<vmem>>, vector<1x1x384xf32>
    %37 = vector.shape_cast %36 : vector<1x1x384xf32> to vector<1x384xf32>
    %38 = vector.shape_cast %35 : vector<1x384xf32> to vector<1x1x384xf32>
    tpu.vector_store %arg4[%c0_22, %c2_23, %c0_24], %38 {strides = array<i32>} : memref<1x3x384xf32, #tpu.memory_space<vmem>>, vector<1x1x384xf32>,
    return
  }
  func.func @transform_0(%arg0: i32, %arg1: i32) -> (i32, i32) {
    %c1_i32 = arith.constant 1 : i32
    %0 = arith.muli %arg0, %c1_i32 : i32
    %1 = arith.addi %0, %arg1 : i32
    %c0_i32 = arith.constant 0 : i32
    %2 = arith.minsi %1, %c0_i32 : i32
    %c0_i32_0 = arith.constant 0 : i32
    %c0_i32_1 = arith.constant 0 : i32
    return %2, %c0_i32_0 : i32, i32
  }
  func.func @transform_1(%arg0: i32, %arg1: i32) -> (i32, i32) {
    %c1_i32 = arith.constant 1 : i32
    %0 = arith.muli %arg0, %c1_i32 : i32
    %1 = arith.addi %0, %arg1 : i32
    %c0_i32 = arith.constant 0 : i32
    %2 = arith.minsi %1, %c0_i32 : i32
    %c0_i32_0 = arith.constant 0 : i32
    %c0_i32_1 = arith.constant 0 : i32
    return %2, %c0_i32_0 : i32, i32
  }
  func.func @transform_2(%arg0: i32, %arg1: i32) -> (i32, i32, i32) {
    %c0_i32 = arith.constant 0 : i32
    %c0_i32_0 = arith.constant 0 : i32
    %c0_i32_1 = arith.constant 0 : i32
    return %arg0, %c0_i32, %c0_i32_0 : i32, i32, i32
  }
}

</mosaic_0001>

<bundles_post_ra>
// kernel: tpu_custom_call.1
= control target key start
LH: loop header
LB: loop body
LE: loop exit
PB: predicated region body
PF: predicated region fallthrough
CT: control target
= control target key end

     0   :  { %7 = vsyncpa [#allocation3], 0  ;;  %s588_s0 = inlined_call_operand.hbm [shape: f32[20,384], index: 0, kind: input, shape index: {}]   ;;  %s589_s1 = inlined_call_operand.hbm [shape: f32[20,384], index: 1, kind: input, shape index: {}]   ;;  %s590_s2 = inlined_call_operand.vmem [shape: f32[1,3,384], index: 2, kind: output, shape index: {}]  }
   0x1   :  { %8 = vsyncpa [#allocation5], 0  ;;  %s426_s9 = smov [#allocation2]  }
   0x2   :  { %s21_s10 = sshll.u32 %s426_s9, 4  ;;  %s22_s10 = int_to_ptr.vmem [resolvable:$true] %s21_s10 }
   0x3   :  { %s390_s11 = scalar_lea.vmem %s22_s10, 1152  ;;  %p395_p1 = scmp.lt.s32.totalorder %s22_s10, %s22_s10 }
   0x4   :  { %p391_p0 = scmp.ne.s32.totalorder %s22_s10, %s390_s11  ;;  %p396_p2 = scmp.lt.s32.totalorder %s390_s11, %s390_s11 }
   0x6   :  { %p397_p3 = por %p396_p2, %p395_p1 }
   0x8   :  { %p398_p4 = pnand %p397_p3, %p391_p0 }
   0xa   :  { %401 = shalt.err (!%p398_p4)
}
   0xb   :  { %s427_s12 = smov 384   ;;  %s428_s13 = smov 24  }
   0xc   :  { %27 = dma.hbm_to_vmem [thread:$0]  %s588_s0, 1152, %s22_s10, [#allocation3], %s427_s12, %s427_s12, %s428_s13  }
   0xd   :  { %s429_s16 = smov [#allocation4]  }
   0xe   :  { %s40_s17 = sshll.u32 %s429_s16, 4  ;;  %s41_s17 = int_to_ptr.vmem [resolvable:$true] %s40_s17 }
   0xf   :  { %s410_s18 = scalar_lea.vmem %s41_s17, 1152  ;;  %p415_p6 = scmp.lt.s32.totalorder %s41_s17, %s41_s17 }
  0x10   :  { %p411_p5 = scmp.ne.s32.totalorder %s41_s17, %s410_s18  ;;  %p416_p7 = scmp.lt.s32.totalorder %s410_s18, %s410_s18 }
  0x12   :  { %p417_p8 = por %p416_p7, %p415_p6 }
  0x14   :  { %p418_p9 = pnand %p417_p8, %p411_p5 }
  0x16   :  { %421 = shalt.err (!%p418_p9)
}
  0x17   :  { %46 = dma.hbm_to_vmem [thread:$0]  %s589_s1, 1152, %s41_s17, [#allocation5], %s427_s12, %s427_s12, %s428_s13  }
  0x18   :  { %422 = dma.done.wait [#allocation3], 1152  }
  0x19   :  { %423 = vsyncadd [#allocation3], 4294966144 }
  0x1a   :  { %424 = dma.done.wait [#allocation5], 1152  }
  0x1b   :  { %425 = vsyncadd [#allocation5], 4294966144  ;;  %v430_v0 = vmov 0.0   ;;  %v67_v1 = vld [vmem:[#allocation2] sm:$0xff]  ;;  %v68_v2 = vld [vmem:[#allocation2 + $0x8] sm:$0xff]  ;;  %vm159_vm0 = vcmask 1043456   ;;  %v193_v55 = vlaneseq }
  0x1c   :  { %65 = vst [vmem:[%s590_s2] sm:$0x77] %v430_v0  ;;  %66 = vst [vmem:[%s590_s2 + $0x8] sm:$0x7] %v430_v0  ;;  %v69_v3 = vld [vmem:[#allocation2 + $0x10] sm:$0xff]  ;;  %v70_v4 = vld [vmem:[#allocation2 + $0x18] sm:$0xff]  ;;  %v94_v7 = vsub.f32 1.0, %v67_v1 }
  0x1d   :  { %v71_v5 = vld [vmem:[#allocation2 + $0x20] sm:$0xff]  ;;  %v72_v6 = vld [vmem:[#allocation2 + $0x28] sm:$0xff]  ;;  %v95_v8 = vsub.f32 1.0, %v68_v2  ;;  %v96_v9 = vsub.f32 1.0, %v69_v3  ;;  %v73_v10 = vld [vmem:[#allocation2 + $0x30] sm:$0xf] }
  0x1e   :  { %v74_v11 = vld [vmem:[#allocation2 + $0x38] sm:$0xf]  ;;  %v75_v12 = vld [vmem:[#allocation2 + $0x40] sm:$0xf]  ;;  %v459_v13 = vld [vmem:[#allocation4] sm:$0xff]  ;;  %v97_v16 = vsub.f32 1.0, %v70_v4 }
  0x1f   :  { %v461_v14 = vld [vmem:[#allocation4 + $0x8] sm:$0xff]  ;;  %v463_v15 = vld [vmem:[#allocation4 + $0x10] sm:$0xff]  ;;  %v98_v17 = vsub.f32 1.0, %v71_v5  ;;  %v99_v18 = vsub.f32 1.0, %v72_v6  ;;  %v465_v19 = vld [vmem:[#allocation4 + $0x18] sm:$0xff]  ;;  %vm85_vm1 = vcmp.ge.f32.partialorder %v459_v13, 0.5 }
  0x20   :  { %v467_v20 = vld [vmem:[#allocation4 + $0x20] sm:$0xff]  ;;  %v469_v21 = vld [vmem:[#allocation4 + $0x28] sm:$0xff]  ;;  %vm86_vm2 = vcmp.ge.f32.partialorder %v461_v14, 0.5  ;;  %vm87_vm3 = vcmp.ge.f32.partialorder %v463_v15, 0.5  ;;  %v474_v22 = vld [vmem:[#allocation4 + $0x30] sm:$0xf]  ;;  %v103_v25 = vsel %vm85_vm1, %v67_v1, %v94_v7 }
  0x21   :  { %v476_v23 = vld [vmem:[#allocation4 + $0x38] sm:$0xf]  ;;  %v478_v24 = vld [vmem:[#allocation4 + $0x40] sm:$0xf]  ;;  %v104_v26 = vsel %vm86_vm2, %v68_v2, %v95_v8  ;;  %v105_v27 = vsel %vm87_vm3, %v69_v3, %v96_v9  ;;  %vm88_vm4 = vcmp.ge.f32.partialorder %v465_v19, 0.5  ;;  %vm89_vm5 = vcmp.ge.f32.partialorder %v467_v20, 0.5 }
  0x22   :  { %vm90_vm6 = vcmp.ge.f32.partialorder %v469_v21, 0.5  ;;  %vm91_vm7 = vcmp.ge.f32.partialorder %v474_v22, 0.5  ;;  %vm92_vm8 = vcmp.ge.f32.partialorder %v476_v23, 0.5  ;;  %vm93_vm9 = vcmp.ge.f32.partialorder %v478_v24, 0.5 }
  0x23   :  { %v100_v28 = vsub.f32 1.0, %v73_v10  ;;  %v101_v29 = vsub.f32 1.0, %v74_v11  ;;  %v102_v30 = vsub.f32 1.0, %v75_v12  ;;  %v106_v31 = vsel %vm88_vm4, %v70_v4, %v97_v16  ;;  %v157_v22 = vld [vmem:[%s590_s2] ss:$4 sm:$0x7] }
  0x24   :  { %v107_v32 = vsel %vm89_vm5, %v71_v5, %v98_v17  ;;  %v108_v33 = vsel %vm90_vm6, %v72_v6, %v99_v18  ;;  %364 = vlog2.f32 %v103_v25  ;;  %v345_v36 = vsel %vm85_vm1, 1.0, %v430_v0 }
  0x25   :  { %v109_v34 = vsel %vm91_vm7, %v73_v10, %v100_v28  ;;  %v110_v35 = vsel %vm92_vm8, %v74_v11, %v101_v29  ;;  %v111_v37 = vsel %vm93_vm9, %v75_v12, %v102_v30  ;;  %366 = vlog2.f32 %v104_v26 }
  0x26   :  { %v346_v38 = vsel %vm86_vm2, 1.0, %v430_v0  ;;  %v347_v39 = vsel %vm87_vm3, 1.0, %v430_v0  ;;  %368 = vlog2.f32 %v105_v27  ;;  %v348_v40 = vsel %vm88_vm4, 1.0, %v430_v0 }
  0x27   :  { %v349_v41 = vsel %vm89_vm5, 1.0, %v430_v0  ;;  %v350_v42 = vsel %vm90_vm6, 1.0, %v430_v0  ;;  %370 = vlog2.f32 %v106_v31  ;;  %v351_v43 = vsel %vm91_vm7, 1.0, %v430_v0 }
  0x28   :  { %v352_v44 = vsel %vm92_vm8, 1.0, %v430_v0  ;;  %v353_v45 = vsel %vm93_vm9, 1.0, %v430_v0  ;;  %372 = vlog2.f32 %v107_v32  ;;  %v158_v46 = vadd.f32 %v348_v40, %v345_v36 }
  0x29   :  { %v160_v47 = vsel %vm159_vm0, %v351_v43, 0.0  ;;  %v168_v48 = vadd.f32 %v349_v41, %v346_v38  ;;  %374 = vlog2.f32 %v108_v33  ;;  %v169_v49 = vsel %vm159_vm0, %v352_v44, 0.0 }
  0x2a   :  { %v177_v50 = vadd.f32 %v350_v42, %v347_v39  ;;  %v178_v51 = vsel %vm159_vm0, %v353_v45, 0.0  ;;  %376 = vlog2.f32 %v109_v34  ;;  %v161_v52 = vadd.f32 %v160_v47, %v158_v46 }
  0x2b   :  { %v170_v53 = vadd.f32 %v169_v49, %v168_v48  ;;  %378 = vlog2.f32 %v110_v35  ;;  %v431_v58 = vmov 1966171168   ;;  %v194_v3 = vshrl.u32 %v193_v55, 7 }
  0x2c   :  { %v179_v54 = vadd.f32 %v178_v51, %v177_v50  ;;  %380 = vlog2.f32 %v111_v37  ;;  %v162_v56 = vrot.slane %v161_v52, 4  ;;  %v191_v59 = vunpack.c.l.s4 %v431_v58 }
  0x2d   :  { %v171_v57 = vrot.slane %v170_v53, 4  ;;  %vm533_vm10 = vcmp.lt.s32.totalorder %v193_v55, 384 }
  0x2e   :  { %v180_v60 = vrot.slane %v179_v54, 4  ;;  %v163_v61 = vadd.f32 %v162_v56, %v161_v52  ;;  %v192_v2 = vunpack.c.0.s8 %v191_v59 }
  0x2f   :  { %v172_v62 = vadd.f32 %v171_v57, %v170_v53 }
  0x30   :  { %v181_v63 = vadd.f32 %v180_v60, %v179_v54  ;;  %v164_v0 = vrot.slane %v163_v61, 2  ;;  %v525_v25 = vsub.s32 %v192_v2, %v194_v3 }
  0x31   :  { %v173_v1 = vrot.slane %v172_v62, 2  ;;  %v365_v4 = vpop.eup %364 }
  0x32   :  { %v182_v5 = vrot.slane %v181_v63, 2  ;;  %v367_v6 = vpop.eup %366  ;;  %v165_v7 = vadd.f32 %v164_v0, %v163_v61  ;;  %v113_v9 = vmul.f32 0.6931472, %v365_v4 }
  0x33   :  { %v174_v8 = vadd.f32 %v173_v1, %v172_v62  ;;  %v369_v10 = vpop.eup %368  ;;  %v115_v12 = vmul.f32 0.6931472, %v367_v6 }
  0x34   :  { %v183_v11 = vadd.f32 %v182_v5, %v181_v63  ;;  %v371_v16 = vpop.eup %370  ;;  %v166_v17 = vrot.slane %v165_v7, 1  ;;  %v117_v26 = vmul.f32 0.6931472, %v369_v10  ;;  %v148_v30 = vsel %vm85_vm1, %v113_v9, 0.0 }
  0x35   :  { %v175_v18 = vrot.slane %v174_v8, 1  ;;  %v373_v27 = vpop.eup %372  ;;  %v119_v29 = vmul.f32 0.6931472, %v371_v16  ;;  %v149_v31 = vsel %vm86_vm2, %v115_v12, 0.0 }
  0x36   :  { %v184_v28 = vrot.slane %v183_v11, 1  ;;  %v375_v32 = vpop.eup %374  ;;  %v167_v33 = vadd.f32 %v166_v17, %v165_v7  ;;  %v121_v35 = vmul.f32 0.6931472, %v373_v27  ;;  %v150_v36 = vsel %vm87_vm3, %v117_v26, 0.0 }
  0x37   :  { %v176_v34 = vadd.f32 %v175_v18, %v174_v8  ;;  %v377_v37 = vpop.eup %376  ;;  %v123_v40 = vmul.f32 0.6931472, %v375_v32  ;;  %v151_v13 = vsel %vm88_vm4, %v119_v29, 0.0  ;;  %v279_v41 = vadd.f32 %v119_v29, %v113_v9 }
  0x38   :  { %v185_v38 = vadd.f32 %v184_v28, %v183_v11  ;;  %v379_v14 = vpop.eup %378  ;;  %v125_v43 = vmul.f32 0.6931472, %v377_v37  ;;  %v152_v44 = vsel %vm89_vm5, %v121_v35, 0.0  ;;  %v221_v45 = vadd.f32 %v151_v13, %v148_v30 }
  0x39   :  { %v189_v42 = vcombine.low %v167_v33, %v176_v34  ;;  %v381_v15 = vpop.eup %380  ;;  %v127_v47 = vmul.f32 0.6931472, %v379_v14  ;;  %v153_v48 = vsel %vm90_vm6, %v123_v40, 0.0  ;;  %v230_v49 = vadd.f32 %v152_v44, %v149_v31 }
  0x3a   :  { %v203_v46 = vrot.slane %v185_v38, %v525_v25  ;;  %v129_v19 = vmul.f32 0.6931472, %v381_v15  ;;  %v154_v51 = vsel %vm91_vm7, %v125_v43, 0.0  ;;  %v239_v52 = vadd.f32 %v153_v48, %v150_v36 }
  0x3b   :  { %v196_v50 = vrot.slane %v189_v42, %v525_v25  ;;  %v155_v20 = vsel %vm92_vm8, %v127_v47, 0.0  ;;  %v222_v53 = vsel %vm159_vm0, %v154_v51, 0.0  ;;  %v280_v54 = vsel %vm159_vm0, %v125_v43, 0.0 }
  0x3c   :  { %v288_v55 = vadd.f32 %v121_v35, %v115_v12  ;;  %v156_v21 = vsel %vm93_vm9, %v129_v19, 0.0  ;;  %v223_v57 = vadd.f32 %v222_v53, %v221_v45  ;;  %v231_v58 = vsel %vm159_vm0, %v155_v20, 0.0  ;;  %v354_v53 = vld [vmem:[%s590_s2 + $0x1] ss:$4 sm:$0x7] }
  0x3d   :  { %v204_v56 = vcombine.low %v196_v50, %v203_v46  ;;  %v232_v59 = vadd.f32 %v231_v58, %v230_v49  ;;  %v240_v23 = vsel %vm159_vm0, %v156_v21, 0.0  ;;  %v281_v60 = vadd.f32 %v280_v54, %v279_v41 }
  0x3e   :  { %v289_v61 = vsel %vm159_vm0, %v127_v47, 0.0  ;;  %v224_v63 = vrot.slane %v223_v57, 4  ;;  %v241_v0 = vadd.f32 %v240_v23, %v239_v52  ;;  %v297_v3 = vadd.f32 %v123_v40, %v117_v26 }
  0x3f   :  { %v211_v62 = vrot.slane %v204_v56, %v525_v25  ;;  %v290_v1 = vadd.f32 %v289_v61, %v288_v55  ;;  %v233_v24 = vrot.slane %v232_v59, 4  ;;  %v282_v2 = vrot.slane %v281_v60, 4  ;;  %v356_v56 = vld [vmem:[%s590_s2 + $0x2] ss:$4 sm:$0x7] }
  0x40   :  { %v298_v4 = vsel %vm159_vm0, %v129_v19, 0.0  ;;  %v225_v6 = vadd.f32 %v224_v63, %v223_v57  ;;  %v242_v7 = vrot.slane %v241_v0, 4 }
  0x41   :  { %v213_v5 = vadd.f32 %v211_v62, %v157_v22  ;;  %v291_v8 = vrot.slane %v290_v1, 4  ;;  %v234_v9 = vadd.f32 %v233_v24, %v232_v59  ;;  %v283_v10 = vadd.f32 %v282_v2, %v281_v60 }
  0x42   :  { %v299_v11 = vadd.f32 %v298_v4, %v297_v3  ;;  %v226_v12 = vrot.slane %v225_v6, 2  ;;  %v243_v16 = vadd.f32 %v242_v7, %v241_v0 }
  0x43   :  { %218 = vst.msk [vmem:[%s590_s2] ss:$4 sm:$0x7] %vm533_vm10, %v213_v5  ;;  %v292_v17 = vadd.f32 %v291_v8, %v290_v1  ;;  %v235_v18 = vrot.slane %v234_v9, 2  ;;  %v284_v26 = vrot.slane %v283_v10, 2 }
  0x44   :  { %v300_v27 = vrot.slane %v299_v11, 4  ;;  %v227_v28 = vadd.f32 %v226_v12, %v225_v6  ;;  %v244_v29 = vrot.slane %v243_v16, 2 }
  0x45   :  { %v293_v30 = vrot.slane %v292_v17, 2  ;;  %v236_v31 = vadd.f32 %v235_v18, %v234_v9  ;;  %v285_v32 = vadd.f32 %v284_v26, %v283_v10 }
  0x46   :  { %v301_v33 = vadd.f32 %v300_v27, %v299_v11  ;;  %v228_v34 = vrot.slane %v227_v28, 1  ;;  %v245_v35 = vadd.f32 %v244_v29, %v243_v16 }
  0x47   :  { %v294_v36 = vadd.f32 %v293_v30, %v292_v17  ;;  %v237_v37 = vrot.slane %v236_v31, 1  ;;  %v286_v38 = vrot.slane %v285_v32, 1 }
  0x48   :  { %v302_v40 = vrot.slane %v301_v33, 2  ;;  %v229_v13 = vadd.f32 %v228_v34, %v227_v28  ;;  %v246_v41 = vrot.slane %v245_v35, 1 }
  0x49   :  { %v295_v14 = vrot.slane %v294_v36, 1  ;;  %v238_v42 = vadd.f32 %v237_v37, %v236_v31  ;;  %v287_v43 = vadd.f32 %v286_v38, %v285_v32 }
  0x4a   :  { %v303_v44 = vadd.f32 %v302_v40, %v301_v33  ;;  %v247_v45 = vadd.f32 %v246_v41, %v245_v35 }
  0x4b   :  { %v296_v15 = vadd.f32 %v295_v14, %v294_v36  ;;  %v251_v46 = vcombine.low %v229_v13, %v238_v42 }
  0x4c   :  { %v304_v47 = vrot.slane %v303_v44, 1  ;;  %v265_v48 = vrot.slane %v247_v45, %v525_v25 }
  0x4d   :  { %v309_v49 = vcombine.low %v287_v43, %v296_v15  ;;  %v258_v50 = vrot.slane %v251_v46, %v525_v25 }
  0x4e   :  { %v305_v19 = vadd.f32 %v304_v47, %v303_v44 }
  0x4f   :  { %v316_v51 = vrot.slane %v309_v49, %v525_v25  ;;  %v266_v52 = vcombine.low %v258_v50, %v265_v48 }
  0x50   :  { %v323_v20 = vrot.slane %v305_v19, %v525_v25 }
  0x51   :  { %v273_v54 = vrot.slane %v266_v52, %v525_v25 }
  0x52   :  { %v324_v55 = vcombine.low %v316_v51, %v323_v20 }
  0x53   :  { %v275_v21 = vadd.f32 %v354_v53, %v273_v54 }
  0x54   :  { %v331_v57 = vrot.slane %v324_v55, %v525_v25 }
  0x55   :  { %355 = vst.msk [vmem:[%s590_s2 + $0x1] ss:$4 sm:$0x7] %vm533_vm10, %v275_v21 }
  0x56   :  { %v333_v58 = vadd.f32 %v356_v56, %v331_v57 }
  0x58   :  { %357 = vst.msk [vmem:[%s590_s2 + $0x2] ss:$4 sm:$0x7] %vm533_vm10, %v333_v58 }
  0x59   :  { %339 = vsyncpa [#allocation3], 1 }
  0x5a   :  { %340 = vsyncpa [#allocation5], 1 }

</bundles_post_ra>
